<compile_context>
chip_gen: v7x
topology: tpu7x:2x2x1
jax: 0.10.0
libtpu: 0.0.40
codegen_flags: <defaults>
</compile_context>

<pallas_src>
import functools

import jax
import jax.numpy as jnp
import numpy as np
from jax.experimental import pallas as pl
from jax.experimental.pallas import tpu as pltpu


def _round_up(x, m):
    return ((x + m - 1) // m) * m


def _supcon_tile_kernel(*refs, temperature, base_temperature, n_anchor,
                        n_contrast, tile_a, tile_n, use_labels):
    """One (row-tile i, column-tile j) step of the SupCon forward pass.

    labels mode refs: a_id(TA,1) i32, c_id(1,TN) i32, anchor(TA,Dp) mx,
                      contrast_t(Dp,TN) mx, out(1,8,128) f32,
                      m_run/l_run/pos_sum/pos_dot (TA,1) f32 scratch.
    mask   mode refs: row_mod(TA,1) i32, mask_cols(bsz,TN) f32, anchor,
                      contrast_t, out, same scratch.
    """
    if use_labels:
        (a_id_ref, c_id_ref, anchor_ref, contrast_ref, out_ref,
         m_ref, l_ref, psum_ref, pdot_ref) = refs
    else:
        (row_mod_ref, mask_cols_ref, anchor_ref, contrast_ref, out_ref,
         m_ref, l_ref, psum_ref, pdot_ref) = refs

    j = pl.program_id(1)
    r0 = pl.program_id(0) * tile_a
    c0 = j * tile_n
    neg_big = jnp.float32(-1e30)

    @pl.when(j == 0)
    def _init():
        m_ref[...] = jnp.full_like(m_ref, neg_big)
        l_ref[...] = jnp.zeros_like(l_ref)
        psum_ref[...] = jnp.zeros_like(psum_ref)
        pdot_ref[...] = jnp.zeros_like(pdot_ref)

    # logits tile (f32 accumulate on the MXU); 1/temperature is already folded
    # into the anchor operand, and the RHS is pre-transposed to (Dp, TN).
    logits = jnp.dot(anchor_ref[...], contrast_ref[...],
                     preferred_element_type=jnp.float32)        # (TA, TN)
    ta, tn = logits.shape

    # invalid = self-contrast pair OR padded (>= N) contrast column,
    # built once from a (TA,1) + (1,TN) iota pair and reused below.
    row = r0 + jax.lax.broadcasted_iota(jnp.int32, (ta, 1), 0)
    col = c0 + jax.lax.broadcasted_iota(jnp.int32, (1, tn), 1)
    invalid = row == col
    if n_contrast % tile_n != 0:
        invalid = jnp.logical_or(invalid, col >= n_contrast)

    # Positive-pair mask tile, rebuilt in VMEM (never DMA'd as A x N).
    if use_labels:
        pos = jnp.logical_and(a_id_ref[...] == c_id_ref[...],
                              jnp.logical_not(invalid)).astype(jnp.float32)
    else:
        bsz = mask_cols_ref.shape[0]
        onehot = (row_mod_ref[...] ==
                  jax.lax.broadcasted_iota(jnp.int32, (ta, bsz), 1)
                  ).astype(jnp.float32)                         # (TA, bsz)
        pos = jnp.dot(onehot, mask_cols_ref[...],
                      preferred_element_type=jnp.float32)       # (TA, TN)
        pos = jnp.where(invalid, 0.0, pos)

    # Per-row running sums (no log_prob / shifted-logits arrays materialized).
    psum_ref[...] += jnp.sum(pos, axis=1, keepdims=True)
    pdot_ref[...] += jnp.sum(pos * logits, axis=1, keepdims=True)

    # Online log-sum-exp over the non-self / non-padded columns (f32).
    lm = jnp.where(invalid, neg_big, logits)
    m_prev = m_ref[...]
    m_new = jnp.maximum(m_prev, jnp.max(lm, axis=1, keepdims=True))
    alpha = jnp.exp(m_prev - m_new)
    l_ref[...] = alpha * l_ref[...] + jnp.sum(jnp.exp(lm - m_new),
                                              axis=1, keepdims=True)
    m_ref[...] = m_new

    @pl.when(j == pl.num_programs(1) - 1)
    def _finalize():
        lse = m_ref[...] + jnp.log(l_ref[...])                  # (TA, 1)
        pos_sum = psum_ref[...]
        has_pos = pos_sum > 0.0
        denom = jnp.where(has_pos, pos_sum, 1.0)
        mean_log_prob_pos = (pdot_ref[...] - pos_sum * lse) / denom
        loss_row = -(temperature / base_temperature) * mean_log_prob_pos
        row_valid = (r0 + jax.lax.broadcasted_iota(jnp.int32, (ta, 1), 0)
                     ) < n_anchor
        loss_row = jnp.where(jnp.logical_and(row_valid, has_pos),
                             loss_row, 0.0)
        # Lane-dense (8,128) output block; wrapper reads element [0,0].
        out_ref[...] = jnp.full(out_ref.shape, jnp.sum(loss_row),
                                dtype=jnp.float32)


def supcon_loss(features, labels=None, mask=None, *, temperature=0.07,
                contrast_mode='all', base_temperature=0.07,
                tile_a=256, tile_n=512, matmul_dtype=jnp.bfloat16):
    """JAX/Pallas port of SupConLoss.forward.

    features: [bsz, n_views, ...] (extra dims flattened to one feature dim)
    labels:   optional [bsz] integer labels
    mask:     optional [bsz, bsz] float contrastive mask
    matmul_dtype: dtype for the MXU matmul operands (bf16 default for perf;
                  pass jnp.float32 for a bit-faithful reference comparison).
    Returns a scalar float32 loss.  Anchors with no positive pairs contribute
    0 (the PyTorch reference would produce NaN).
    """
    if features.ndim < 3:
        raise ValueError('`features` needs to be [bsz, n_views, ...]')
    bsz, n_views = features.shape[0], features.shape[1]
    features = features.reshape(bsz, n_views, -1)

    if labels is not None and mask is not None:
        raise ValueError('Cannot define both `labels` and `mask`')

    use_labels = mask is None
    if use_labels:
        if labels is None:
            ids = jnp.arange(bsz, dtype=jnp.int32)      # SimCLR: identity mask
        else:
            labels = jnp.asarray(labels).reshape(-1)
            if labels.shape[0] != bsz:
                raise ValueError('Num of labels does not match num of features')
            ids = labels.astype(jnp.int32)
    else:
        base_mask = jnp.asarray(mask).astype(jnp.float32)

    contrast_count = n_views
    # torch.cat(torch.unbind(features, dim=1), dim=0): view-major concat.
    contrast_feature = jnp.concatenate(
        [features[:, v, :] for v in range(n_views)], axis=0)    # [N, D]

    if contrast_mode == 'one':
        anchor_feature = features[:, 0, :]
        anchor_count = 1
    elif contrast_mode == 'all':
        anchor_feature = contrast_feature
        anchor_count = contrast_count
    else:
        raise ValueError('Unknown mode: {}'.format(contrast_mode))

    A, D = anchor_feature.shape
    N = contrast_feature.shape[0]

    # ---- tiling ----------------------------------------------------------
    d_pad = _round_up(D, 128)                 # lane-aligned MXU contraction
    ta_cap = min(int(tile_a), _round_up(A, 8))
    num_row_tiles = max(1, -(-A // ta_cap))
    if num_row_tiles < 2 and A > 8:
        num_row_tiles = 2                     # keep both TensorCores busy
    ta = _round_up(-(-A // num_row_tiles), 8)
    a_pad = ta * num_row_tiles

    tn_cap = min(int(tile_n), _round_up(N, 128))
    tn = max(128, (tn_cap // 128) * 128)
    num_col_tiles = max(1, -(-N // tn))
    n_pad = tn * num_col_tiles

    # ---- operand preparation (wrapper-side layout plumbing) ---------------
    mx = jnp.dtype(matmul_dtype)
    inv_t = 1.0 / float(temperature)
    # 1/T is folded into the anchor operand; the scale fuses with the dtype
    # cast the bf16 MXU path needs anyway (done once, not per column tile).
    anchor_scaled = (anchor_feature.astype(jnp.float32) * inv_t).astype(mx)
    anchor_scaled = jnp.pad(anchor_scaled, ((0, a_pad - A), (0, d_pad - D)))
    # Pre-transpose contrast to (D, N) once so the kernel dot contracts (1,0)
    # with no per-tile in-kernel transpose.
    contrast_t = jnp.pad(contrast_feature.astype(mx).T,
                         ((0, d_pad - D), (0, n_pad - N)))

    if use_labels:
        a_ids = jnp.pad(jnp.tile(ids, anchor_count),
                        (0, a_pad - A)).reshape(a_pad, 1)
        c_ids = jnp.pad(jnp.tile(ids, contrast_count),
                        (0, n_pad - N)).reshape(1, n_pad)
        mask_args = (a_ids, c_ids)
        mask_specs = [
            pl.BlockSpec((ta, 1), lambda i, j: (i, 0)),
            pl.BlockSpec((1, tn), lambda i, j: (0, j)),
        ]
        meta_cols = 1
    else:
        row_mod = (jnp.arange(A, dtype=jnp.int32) % bsz)
        row_mod = jnp.pad(row_mod, (0, a_pad - A)).reshape(a_pad, 1)
        # (bsz, N) repeated base mask: O(bsz*N) HBM, never the (A, N) mask.
        mask_cols = jnp.pad(jnp.tile(base_mask, (1, contrast_count)),
                            ((0, 0), (0, n_pad - N)))
        mask_args = (row_mod, mask_cols)
        mask_specs = [
            pl.BlockSpec((ta, 1), lambda i, j: (i, 0)),
            pl.BlockSpec((bsz, tn), lambda i, j: (0, j)),
        ]
        meta_cols = bsz

    feat_specs = [
        pl.BlockSpec((ta, d_pad), lambda i, j: (i, 0)),   # anchor row tile
        pl.BlockSpec((d_pad, tn), lambda i, j: (0, j)),   # contrast col tile
    ]

    kernel = functools.partial(
        _supcon_tile_kernel,
        temperature=float(temperature),
        base_temperature=float(base_temperature),
        n_anchor=A, n_contrast=N, tile_a=ta, tile_n=tn,
        use_labels=use_labels)

    # ---- VMEM budget + cost hint ------------------------------------------
    mx_bytes = mx.itemsize
    working_set = (
        2 * (ta * d_pad + d_pad * tn) * mx_bytes      # double-buffered feats
        + 2 * (ta + meta_cols * tn) * 4               # mask metadata blocks
        + 2 * 8 * 128 * 4                             # output block
        + 4 * ta * 128 * 4                            # (TA,1) scratch (lane pad)
        + 10 * ta * tn * 4)                           # (TA,TN) f32 temporaries
    vmem_limit = int(min(64 << 20, max(2 * working_set, 32 << 20)))

    cost = pl.CostEstimate(
        flops=2 * a_pad * n_pad * d_pad,
        transcendentals=a_pad * n_pad,
        bytes_accessed=(a_pad * d_pad + num_row_tiles * d_pad * n_pad)
        * mx_bytes + num_row_tiles * 8 * 128 * 4)

    partials = pl.pallas_call(
        kernel,
        out_shape=jax.ShapeDtypeStruct((num_row_tiles, 8, 128), jnp.float32),
        grid=(num_row_tiles, num_col_tiles),
        in_specs=mask_specs + feat_specs,
        out_specs=pl.BlockSpec((1, 8, 128), lambda i, j: (i, 0, 0)),
        scratch_shapes=[pltpu.VMEM((ta, 1), jnp.float32)] * 4,
        compiler_params=pltpu.CompilerParams(
            dimension_semantics=("parallel", "arbitrary"),
            vmem_limit_bytes=vmem_limit),
        cost_estimate=cost,
    )(*mask_args, anchor_scaled, contrast_t)

    # loss.view(anchor_count, batch_size).mean() == sum over all anchors / A.
    return jnp.sum(partials[:, 0, 0]) / A


def _supcon_loss_ref(features, labels=None, mask=None, *, temperature=0.07,
                     contrast_mode='all', base_temperature=0.07):
    """Pure-JAX reference mirroring the PyTorch code (for validation)."""
    bsz, n_views = features.shape[0], features.shape[1]
    features = features.reshape(bsz, n_views, -1)
    if labels is None and mask is None:
        mask = jnp.eye(bsz, dtype=jnp.float32)
    elif labels is not None:
        labels = labels.reshape(-1, 1)
        mask = (labels == labels.T).astype(jnp.float32)
    else:
        mask = mask.astype(jnp.float32)
    contrast_feature = jnp.concatenate(
        [features[:, v, :] for v in range(n_views)], axis=0)
    if contrast_mode == 'one':
        anchor_feature, anchor_count = features[:, 0, :], 1
    else:
        anchor_feature, anchor_count = contrast_feature, n_views
    logits = anchor_feature @ contrast_feature.T / temperature
    logits = logits - jnp.max(logits, axis=1, keepdims=True)
    mask = jnp.tile(mask, (anchor_count, n_views))
    A, N = mask.shape
    logits_mask = 1.0 - jnp.eye(A, N, dtype=jnp.float32)
    mask = mask * logits_mask
    exp_logits = jnp.exp(logits) * logits_mask
    log_prob = logits - jnp.log(jnp.sum(exp_logits, axis=1, keepdims=True))
    mean_log_prob_pos = jnp.sum(mask * log_prob, axis=1) / jnp.sum(mask, axis=1)
    loss = -(temperature / base_temperature) * mean_log_prob_pos
    return jnp.mean(loss)


if __name__ == "__main__":
    key = jax.random.PRNGKey(0)
    k_feat, k_lab = jax.random.split(key)

    bsz, n_views, dim = 8, 2, 32
    features = jax.random.normal(k_feat, (bsz, n_views, dim), dtype=jnp.float32)
    # L2-normalize per feature vector (typical SupCon input).
    features = features / jnp.linalg.norm(features, axis=-1, keepdims=True)
    labels = jax.random.randint(k_lab, (bsz,), 0, 4)
    explicit_mask = (labels[:, None] == labels[None, :]).astype(jnp.float32)

    cases = [
        dict(labels=labels),                       # supervised, 'all'
        dict(),                                    # SimCLR (no labels/mask)
        dict(mask=explicit_mask),                  # explicit base-mask path
        dict(labels=labels, contrast_mode='one'),  # anchor = first view only
    ]
    for kwargs in cases:
        want = np.asarray(_supcon_loss_ref(features, **kwargs))
        # f32 MXU path: tight check against the pure-JAX/PyTorch reference.
        got_f32 = np.asarray(jax.block_until_ready(
            supcon_loss(features, matmul_dtype=jnp.float32, **kwargs)))
        assert np.allclose(got_f32, want, rtol=1e-4, atol=1e-4), (
            sorted(kwargs.keys()), float(got_f32), float(want))
        # Default bf16 MXU path: looser check (matmul-dtype rounding only).
        got_bf16 = np.asarray(jax.block_until_ready(
            supcon_loss(features, **kwargs)))
        assert np.isfinite(got_bf16)
        assert np.allclose(got_bf16, want, rtol=5e-2, atol=5e-2), (
            sorted(kwargs.keys()), float(got_bf16), float(want))
    print("KERNEL_OK")
</pallas_src>

<mosaic_0001>
module attributes {stable_mosaic.version = 11 : i64} {
  func.func @_supcon_tile_kernel(%arg0: i32, %arg1: i32, %arg2: memref<8x1xi32, #tpu.memory_space<vmem>>, %arg3: memref<1x128xi32, #tpu.memory_space<vmem>>, %arg4: memref<8x128xf32, #tpu.memory_space<vmem>>, %arg5: memref<128x128xf32, #tpu.memory_space<vmem>>, %arg6: memref<1x8x128xf32, #tpu.memory_space<vmem>>, %arg7: memref<8x1xf32, #tpu.memory_space<vmem>>, %arg8: memref<8x1xf32, #tpu.memory_space<vmem>>, %arg9: memref<8x1xf32, #tpu.memory_space<vmem>>, %arg10: memref<8x1xf32, #tpu.memory_space<vmem>>) attributes {dimension_semantics = [#tpu.dimension_semantics<parallel>, #tpu.dimension_semantics<arbitrary>], iteration_bounds = array<i64: 2, 1>, scalar_prefetch = 0 : i64, scratch_operands = 4 : i64, tpu.core_type = #tpu.core_type<tc>, window_params = [{transform_indices = @transform_0, window_bounds = array<i64: 8, 1>}, {transform_indices = @transform_1, window_bounds = array<i64: 1, 128>}, {transform_indices = @transform_2, window_bounds = array<i64: 8, 128>}, {transform_indices = @transform_3, window_bounds = array<i64: 128, 128>}, {transform_indices = @transform_4, window_bounds = array<i64: 1, 8, 128>}]} {
    %c8_i32 = arith.constant 8 : i32
    %0 = arith.muli %arg0, %c8_i32 : i32
    %c128_i32 = arith.constant 128 : i32
    %1 = arith.muli %arg1, %c128_i32 : i32
    %c0_i32 = arith.constant 0 : i32
    %2 = arith.cmpi eq, %arg1, %c0_i32 : i32
    %3 = arith.extui %2 : i1 to i32
    %cst = arith.constant -1.000000e+30 : f32
    %c0_i32_0 = arith.constant 0 : i32
    %4 = arith.cmpi ne, %3, %c0_i32_0 : i32
    scf.if %4 {
      %62 = vector.broadcast %cst : f32 to vector<8x1xf32>
      %c0_33 = arith.constant 0 : index
      %c0_34 = arith.constant 0 : index
      %63 = vector.load %arg7[%c0_33, %c0_34] : memref<8x1xf32, #tpu.memory_space<vmem>>, vector<8x1xf32>
      tpu.vector_store %arg7[%c0_33, %c0_34], %62 {strides = array<i32>} : memref<8x1xf32, #tpu.memory_space<vmem>>, vector<8x1xf32>,
      %cst_35 = arith.constant 0.000000e+00 : f32
      %64 = vector.broadcast %cst_35 : f32 to vector<8x1xf32>
      %c0_36 = arith.constant 0 : index
      %c0_37 = arith.constant 0 : index
      %65 = vector.load %arg8[%c0_36, %c0_37] : memref<8x1xf32, #tpu.memory_space<vmem>>, vector<8x1xf32>
      tpu.vector_store %arg8[%c0_36, %c0_37], %64 {strides = array<i32>} : memref<8x1xf32, #tpu.memory_space<vmem>>, vector<8x1xf32>,
      %cst_38 = arith.constant 0.000000e+00 : f32
      %66 = vector.broadcast %cst_38 : f32 to vector<8x1xf32>
      %c0_39 = arith.constant 0 : index
      %c0_40 = arith.constant 0 : index
      %67 = vector.load %arg9[%c0_39, %c0_40] : memref<8x1xf32, #tpu.memory_space<vmem>>, vector<8x1xf32>
      tpu.vector_store %arg9[%c0_39, %c0_40], %66 {strides = array<i32>} : memref<8x1xf32, #tpu.memory_space<vmem>>, vector<8x1xf32>,
      %cst_41 = arith.constant 0.000000e+00 : f32
      %68 = vector.broadcast %cst_41 : f32 to vector<8x1xf32>
      %c0_42 = arith.constant 0 : index
      %c0_43 = arith.constant 0 : index
      %69 = vector.load %arg10[%c0_42, %c0_43] : memref<8x1xf32, #tpu.memory_space<vmem>>, vector<8x1xf32>
      tpu.vector_store %arg10[%c0_42, %c0_43], %68 {strides = array<i32>} : memref<8x1xf32, #tpu.memory_space<vmem>>, vector<8x1xf32>,
    } else {
    }
    %c0 = arith.constant 0 : index
    %c0_1 = arith.constant 0 : index
    %5 = vector.load %arg4[%c0, %c0_1] : memref<8x128xf32, #tpu.memory_space<vmem>>, vector<8x128xf32>
    %c0_2 = arith.constant 0 : index
    %c0_3 = arith.constant 0 : index
    %6 = vector.load %arg5[%c0_2, %c0_3] : memref<128x128xf32, #tpu.memory_space<vmem>>, vector<128x128xf32>
    %cst_4 = arith.constant dense<0.000000e+00> : vector<8x128xf32>
    %7 = tpu.matmul %5, %6, %cst_4 {dimension_numbers = #tpu.dot_dimension_numbers<[1], [0], [0], [1], [0, 0, 1, 1], [], []>} : vector<8x128xf32>, vector<128x128xf32>, vector<8x128xf32> -> vector<8x128xf32>
    %8 = tpu.iota {dimensions = array<i32: 0>} : vector<8x1xi32>
    %9 = vector.broadcast %0 : i32 to vector<8x1xi32>
    %10 = arith.addi %9, %8 : vector<8x1xi32>
    %11 = tpu.iota {dimensions = array<i32: 1>} : vector<1x128xi32>
    %12 = vector.broadcast %1 : i32 to vector<1x128xi32>
    %13 = arith.addi %12, %11 : vector<1x128xi32>
    %14 = vector.broadcast %10 : vector<8x1xi32> to vector<8x128xi32>
    %15 = vector.broadcast %13 : vector<1x128xi32> to vector<8x128xi32>
    %16 = arith.cmpi eq, %14, %15 : vector<8x128xi32>
    %c16_i32 = arith.constant 16 : i32
    %17 = vector.broadcast %c16_i32 : i32 to vector<1x128xi32>
    %18 = arith.cmpi sge, %13, %17 : vector<1x128xi32>
    %19 = vector.broadcast %18 : vector<1x128xi1> to vector<8x128xi1>
    %20 = arith.ori %16, %19 : vector<8x128xi1>
    %c0_5 = arith.constant 0 : index
    %c0_6 = arith.constant 0 : index
    %21 = vector.load %arg2[%c0_5, %c0_6] : memref<8x1xi32, #tpu.memory_space<vmem>>, vector<8x1xi32>
    %c0_7 = arith.constant 0 : index
    %c0_8 = arith.constant 0 : index
    %22 = vector.load %arg3[%c0_7, %c0_8] : memref<1x128xi32, #tpu.memory_space<vmem>>, vector<1x128xi32>
    %23 = vector.broadcast %21 : vector<8x1xi32> to vector<8x128xi32>
    %24 = vector.broadcast %22 : vector<1x128xi32> to vector<8x128xi32>
    %25 = arith.cmpi eq, %23, %24 : vector<8x128xi32>
    %cst_9 = arith.constant dense<true> : vector<8x128xi1>
    %26 = arith.xori %20, %cst_9 : vector<8x128xi1>
    %27 = arith.andi %25, %26 : vector<8x128xi1>
    %28 = arith.extui %27 : vector<8x128xi1> to vector<8x128xi32>
    %29 = arith.sitofp %28 : vector<8x128xi32> to vector<8x128xf32>
    %c0_10 = arith.constant 0 : index
    %c0_11 = arith.constant 0 : index
    %30 = vector.load %arg9[%c0_10, %c0_11] : memref<8x1xf32, #tpu.memory_space<vmem>>, vector<8x1xf32>
    %cst_12 = arith.constant dense<0.000000e+00> : vector<8xf32>
    %31 = vector.multi_reduction <add>, %29, %cst_12 [1] : vector<8x128xf32> to vector<8xf32>
    %32 = vector.shape_cast %31 : vector<8xf32> to vector<8x1xf32>
    %33 = arith.addf %30, %32 : vector<8x1xf32>
    %c0_13 = arith.constant 0 : index
    %c0_14 = arith.constant 0 : index
    %34 = vector.load %arg9[%c0_13, %c0_14] : memref<8x1xf32, #tpu.memory_space<vmem>>, vector<8x1xf32>
    tpu.vector_store %arg9[%c0_13, %c0_14], %33 {strides = array<i32>} : memref<8x1xf32, #tpu.memory_space<vmem>>, vector<8x1xf32>,
    %c0_15 = arith.constant 0 : index
    %c0_16 = arith.constant 0 : index
    %35 = vector.load %arg10[%c0_15, %c0_16] : memref<8x1xf32, #tpu.memory_space<vmem>>, vector<8x1xf32>
    %36 = arith.mulf %29, %7 : vector<8x128xf32>
    %cst_17 = arith.constant dense<0.000000e+00> : vector<8xf32>
    %37 = vector.multi_reduction <add>, %36, %cst_17 [1] : vector<8x128xf32> to vector<8xf32>
    %38 = vector.shape_cast %37 : vector<8xf32> to vector<8x1xf32>
    %39 = arith.addf %35, %38 : vector<8x1xf32>
    %c0_18 = arith.constant 0 : index
    %c0_19 = arith.constant 0 : index
    %40 = vector.load %arg10[%c0_18, %c0_19] : memref<8x1xf32, #tpu.memory_space<vmem>>, vector<8x1xf32>
    tpu.vector_store %arg10[%c0_18, %c0_19], %39 {strides = array<i32>} : memref<8x1xf32, #tpu.memory_space<vmem>>, vector<8x1xf32>,
    %cst_20 = arith.constant -1.000000e+30 : f32
    %41 = vector.broadcast %cst_20 : f32 to vector<8x128xf32>
    %42 = arith.select %20, %41, %7 : vector<8x128xi1>, vector<8x128xf32>
    %c0_21 = arith.constant 0 : index
    %c0_22 = arith.constant 0 : index
    %43 = vector.load %arg7[%c0_21, %c0_22] : memref<8x1xf32, #tpu.memory_space<vmem>>, vector<8x1xf32>
    %cst_23 = arith.constant dense<0xFF800000> : vector<8xf32>
    %44 = vector.multi_reduction <maximumf>, %42, %cst_23 [1] : vector<8x128xf32> to vector<8xf32>
    %45 = vector.shape_cast %44 : vector<8xf32> to vector<8x1xf32>
    %46 = arith.maximumf %43, %45 : vector<8x1xf32>
    %47 = arith.subf %43, %46 : vector<8x1xf32>
    %48 = math.exp %47 : vector<8x1xf32>
    %c0_24 = arith.constant 0 : index
    %c0_25 = arith.constant 0 : index
    %49 = vector.load %arg8[%c0_24, %c0_25] : memref<8x1xf32, #tpu.memory_space<vmem>>, vector<8x1xf32>
    %50 = arith.mulf %48, %49 : vector<8x1xf32>
    %51 = vector.broadcast %46 : vector<8x1xf32> to vector<8x128xf32>
    %52 = arith.subf %42, %51 : vector<8x128xf32>
    %53 = math.exp %52 : vector<8x128xf32>
    %cst_26 = arith.constant dense<0.000000e+00> : vector<8xf32>
    %54 = vector.multi_reduction <add>, %53, %cst_26 [1] : vector<8x128xf32> to vector<8xf32>
    %55 = vector.shape_cast %54 : vector<8xf32> to vector<8x1xf32>
    %56 = arith.addf %50, %55 : vector<8x1xf32>
    %c0_27 = arith.constant 0 : index
    %c0_28 = arith.constant 0 : index
    %57 = vector.load %arg8[%c0_27, %c0_28] : memref<8x1xf32, #tpu.memory_space<vmem>>, vector<8x1xf32>
    tpu.vector_store %arg8[%c0_27, %c0_28], %56 {strides = array<i32>} : memref<8x1xf32, #tpu.memory_space<vmem>>, vector<8x1xf32>,
    %c0_29 = arith.constant 0 : index
    %c0_30 = arith.constant 0 : index
    %58 = vector.load %arg7[%c0_29, %c0_30] : memref<8x1xf32, #tpu.memory_space<vmem>>, vector<8x1xf32>
    tpu.vector_store %arg7[%c0_29, %c0_30], %46 {strides = array<i32>} : memref<8x1xf32, #tpu.memory_space<vmem>>, vector<8x1xf32>,
    %c0_i32_31 = arith.constant 0 : i32
    %59 = arith.cmpi eq, %arg1, %c0_i32_31 : i32
    %60 = arith.extui %59 : i1 to i32
    %c0_i32_32 = arith.constant 0 : i32
    %61 = arith.cmpi ne, %60, %c0_i32_32 : i32
    scf.if %61 {
      %c0_33 = arith.constant 0 : index
      %c0_34 = arith.constant 0 : index
      %62 = vector.load %arg7[%c0_33, %c0_34] : memref<8x1xf32, #tpu.memory_space<vmem>>, vector<8x1xf32>
      %c0_35 = arith.constant 0 : index
      %c0_36 = arith.constant 0 : index
      %63 = vector.load %arg8[%c0_35, %c0_36] : memref<8x1xf32, #tpu.memory_space<vmem>>, vector<8x1xf32>
      %64 = math.log %63 : vector<8x1xf32>
      %65 = arith.addf %62, %64 : vector<8x1xf32>
      %c0_37 = arith.constant 0 : index
      %c0_38 = arith.constant 0 : index
      %66 = vector.load %arg9[%c0_37, %c0_38] : memref<8x1xf32, #tpu.memory_space<vmem>>, vector<8x1xf32>
      %cst_39 = arith.constant 0.000000e+00 : f32
      %67 = vector.broadcast %cst_39 : f32 to vector<8x1xf32>
      %68 = arith.cmpf ogt, %66, %67 : vector<8x1xf32>
      %cst_40 = arith.constant 1.000000e+00 : f32
      %69 = vector.broadcast %cst_40 : f32 to vector<8x1xf32>
      %70 = arith.select %68, %66, %69 : vector<8x1xi1>, vector<8x1xf32>
      %c0_41 = arith.constant 0 : index
      %c0_42 = arith.constant 0 : index
      %71 = vector.load %arg10[%c0_41, %c0_42] : memref<8x1xf32, #tpu.memory_space<vmem>>, vector<8x1xf32>
      %72 = arith.mulf %66, %65 : vector<8x1xf32>
      %73 = arith.subf %71, %72 : vector<8x1xf32>
      %74 = arith.divf %73, %70 : vector<8x1xf32>
      %cst_43 = arith.constant -1.000000e+00 : f32
      %75 = vector.broadcast %cst_43 : f32 to vector<8x1xf32>
      %76 = arith.mulf %75, %74 : vector<8x1xf32>
      %77 = tpu.iota {dimensions = array<i32: 0>} : vector<8x1xi32>
      %78 = vector.broadcast %0 : i32 to vector<8x1xi32>
      %79 = arith.addi %78, %77 : vector<8x1xi32>
      %c16_i32_44 = arith.constant 16 : i32
      %80 = vector.broadcast %c16_i32_44 : i32 to vector<8x1xi32>
      %81 = arith.cmpi slt, %79, %80 : vector<8x1xi32>
      %82 = arith.andi %81, %68 : vector<8x1xi1>
      %cst_45 = arith.constant 0.000000e+00 : f32
      %83 = vector.broadcast %cst_45 : f32 to vector<8x1xf32>
      %84 = arith.select %82, %76, %83 : vector<8x1xi1>, vector<8x1xf32>
      %85 = vector.shape_cast %84 : vector<8x1xf32> to vector<1x8x1xf32>
      %cst_46 = arith.constant dense<0.000000e+00> : vector<1xf32>
      %86 = vector.multi_reduction <add>, %85, %cst_46 [1, 2] : vector<1x8x1xf32> to vector<1xf32>
      %87 = vector.shape_cast %86 : vector<1xf32> to vector<1x1x1xf32>
      %88 = vector.extract %87[0, 0, 0] : f32 from vector<1x1x1xf32>
      %89 = vector.broadcast %88 : f32 to vector<1x8x128xf32>
      %c0_47 = arith.constant 0 : index
      %c0_48 = arith.constant 0 : index
      %c0_49 = arith.constant 0 : index
      %90 = vector.load %arg6[%c0_47, %c0_48, %c0_49] : memref<1x8x128xf32, #tpu.memory_space<vmem>>, vector<1x8x128xf32>
      tpu.vector_store %arg6[%c0_47, %c0_48, %c0_49], %89 {strides = array<i32>} : memref<1x8x128xf32, #tpu.memory_space<vmem>>, vector<1x8x128xf32>,
    } else {
    }
    return
  }
  func.func @transform_0(%arg0: i32, %arg1: i32) -> (i32, i32) {
    %c0_i32 = arith.constant 0 : i32
    %c0_i32_0 = arith.constant 0 : i32
    return %arg0, %c0_i32 : i32, i32
  }
  func.func @transform_1(%arg0: i32, %arg1: i32) -> (i32, i32) {
    %c0_i32 = arith.constant 0 : i32
    %c0_i32_0 = arith.constant 0 : i32
    return %c0_i32, %arg1 : i32, i32
  }
  func.func @transform_2(%arg0: i32, %arg1: i32) -> (i32, i32) {
    %c0_i32 = arith.constant 0 : i32
    %c0_i32_0 = arith.constant 0 : i32
    return %arg0, %c0_i32 : i32, i32
  }
  func.func @transform_3(%arg0: i32, %arg1: i32) -> (i32, i32) {
    %c0_i32 = arith.constant 0 : i32
    %c0_i32_0 = arith.constant 0 : i32
    return %c0_i32, %arg1 : i32, i32
  }
  func.func @transform_4(%arg0: i32, %arg1: i32) -> (i32, i32, i32) {
    %c0_i32 = arith.constant 0 : i32
    %c0_i32_0 = arith.constant 0 : i32
    %c0_i32_1 = arith.constant 0 : i32
    return %arg0, %c0_i32, %c0_i32_0 : i32, i32, i32
  }
}

</mosaic_0001>

<bundles_post_ra>
// kernel: tpu_custom_call.1
= control target key start
LH: loop header
LB: loop body
LE: loop exit
PB: predicated region body
PF: predicated region fallthrough
CT: control target
= control target key end

     0   :  { %9 = vsyncpa [#allocation7], 0  ;;  %s1086_s0 = inlined_call_operand.vmem [shape: s32[16,1], index: 0, kind: input, shape index: {}]   ;;  %s1087_s1 = inlined_call_operand.vmem [shape: s32[1,128], index: 1, kind: input, shape index: {}]   ;;  %s1088_s2 = inlined_call_operand.vmem [shape: f32[16,128], index: 2, kind: input, shape index: {}]   ;;  %s1089_s3 = inlined_call_operand.hbm [shape: f32[128,128], index: 3, kind: input, shape index: {}]   ;;  %s1090_s4 = inlined_call_operand.hbm [shape: f32[2,8,128], index: 4, kind: output, shape index: {}]  }
   0x1   :  { %10 = vsyncpa [#allocation8], 0 }
   0x2   :  { %12 = vsyncpa [#allocation8 + $0x1], 0  ;;  %s896_s15 = smov 0   ;;  %s898_s16 = smov 0  }
   0x3   :  { %s900_s17 = smov 0   ;;  %s902_s18 = smov 0  }
   0x4   :  { %s904_s19 = smov 0   ;;  %s906_s20 = smov 0  }
   0x5 LB: > { %s569_s21 = sadd.s32 4294967295, %s859_s20   ;;  %s570_s22 = sadd.s32 4294967294, %s859_s20   ;;  %s859_s20 = sphi %s906_s20, %s18_s20   ;;  %s855_s19 = sphi %s904_s19, %s1110_s19   ;;  %s851_s18 = sphi %s902_s18, %s1109_s18   ;;  %s847_s17 = sphi %s900_s17, %s1108_s17   ;;  %s843_s16 = sphi %s898_s16, %s1107_s16   ;;  %s839_s15 = sphi %s896_s15, %s1106_s15  }
   0x6   : > { %s30_s23 = sadd.s32 1, %s855_s19  ;;  %s141_s24 = sadd.s32 1, %s847_s17 }
   0x7   : > { %p32_p0 = scmp.ge.s32.totalorder %s30_s23, 2  ;;  %p151_p1 = scmp.ne.s32.totalorder %s847_s17, %s843_s16 }
   0x8   : > { %p152_p2 = scmp.eq.s32.totalorder %s569_s21, 1  ;;  %p157_p3 = scmp.ne.s32.totalorder %s843_s16, %s839_s15 }
   0x9   : > { %s1112_s23 = smov (%p32_p0, %s30_s23), 0  ;;  %p158_p5 = scmp.eq.s32.totalorder %s570_s22, 1 }
   0xa   : > { %p936_p4 = por %p152_p2, %p151_p1  ;;  %s138_s26 = ssub.s32 %s855_s19, %s1112_s23 }
   0xb   : > { %p571_p6 = scmp.ge.s32.totalorder %s859_s20, 1  ;;  %p139_p7 = scmp.eq.s32.totalorder %s138_s26, 0 }
   0xc   : > { %s1095_s25 = scalar_select %p936_p4, 1, 0 }
   0xd   : > { %p943_p8 = por %p158_p5, %p157_p3  ;;  %p165_p9 = scmp.lt.s32.totalorder %s859_s20, 3 }
   0xe   : > { %s949_s28 = scalar_select %p139_p7, %s847_s17, %s141_s24  }
   0xf   : > { %s1096_s27 = scalar_select %p943_p8, 1, 0 }
  0x10   : > { %p951_p10 = pnand %p571_p6, %p165_p9  ;;  %p955_p11 = scmp.eq.s32.totalorder %s569_s21, 0 }
  0x11   : > { %s861_s5 = smov [#allocation6]   ;;  %s749_s10 = scalar_lea.hbm %s1089_s3, 2048 }
  0x12   : > { %s1097_s29 = scalar_select %p951_p10, 1, 0 }
  0x13   : > { %s1098_s30 = scalar_select %p955_p11, 1, 0 }
  0x14   : > { %p671_p12 = pneg %p951_p10  ;;  %s185_s6 = sshll.u32 %s861_s5, 4  ;;  %s186_s6 = int_to_ptr.vmem [resolvable:$true] %s185_s6 }
  0x15   : > { %p750_p0 = scmp.ne.s32.totalorder %s1089_s3, %s749_s10  ;;  %p756_p5 = scmp.lt.u32.totalorder %s749_s10, %s1089_s3 }
  0x16   : > { %p963_p13 = pnand %p955_p11, %p671_p12 }
  0x18   : > { %p751_p1 = pneg %p963_p13 }
  0x1a   : > { %p752_p2 = pnand %p751_p1, %p750_p0 }
  0x1c   : > { %p753_p3 = pneg %p752_p2 }
  0x1e   : > { %p758_p6 = pnand %p756_p5, %p753_p3 }
  0x20   : > { %761 = shalt.err (!%p758_p6)
}
  0x21   : > { %s762_s21 = scalar_lea.vmem %s186_s6, 2048  ;;  %p770_p8 = scmp.lt.s32.totalorder %s186_s6, %s186_s6 }
  0x22   : > { %p763_p7 = scmp.ne.s32.totalorder %s186_s6, %s762_s21  ;;  %p771_p4 = scmp.lt.s32.totalorder %s762_s21, %s762_s21 }
  0x24   : > { %p765_p9 = pnand %p763_p7, %p751_p1  ;;  %p772_p11 = por %p771_p4, %p770_p8 }
  0x26   : > { %p766_p12 = pneg %p765_p9 }
  0x28   : > { %p773_p10 = pnand %p772_p11, %p766_p12 }
  0x2a   : > { %776 = shalt.err (!%p773_p10)
}
  0x2b   : > { %s862_s22 = smov 128   ;;  %s863_s24 = smov 8  }
  0x2c   : > { %674 = dma.hbm_to_vmem [thread:$0]  (!%p963_p13), %s1089_s3, 2048, %s186_s6, [#allocation7], %s862_s22, %s862_s22, %s863_s24  }
  0x2d   : > { %p1100_p0 = scmp.ne.s32.totalorder %s1097_s29, 0 }
  0x2e   : > { %p1101_p2 = scmp.ne.s32.totalorder (!%p1100_p0), %s1098_s30, 0 }
  0x2f   : > { %215 = sbr.rel (%p1100_p0) target bundleno = 986 (0x3da), region = 36 }
  0x36   : > { %830 = dma.done.wait (%p1101_p2), [#allocation7], 2048  }
  0x37   : > { %832 = vsyncadd (%p1101_p2), [#allocation7], 4294965248  ;;  %vm264_vm0 = vcmask 7168   ;;  %v864_v0 = vmov 0.0|0.0   ;;  %v865_v1 = vmov 0.0   ;;  %vm866_vm1 = vmmov 0  }
  0x38   : > { %639 = vmatprep.subr.bf16.mxu0 %v864_v0  ;;  %266 = vst.msk [vmem:[#allocation3] sm:$0xff] %vm264_vm0, %v865_v1  ;;  %267 = vst.msk [vmem:[#allocation4] sm:$0xff] %vm264_vm0, %v865_v1  ;;  %636 = vmatprep.mubr.msk.f32.mxu0 %vm866_vm1, %v865_v1  ;;  %p247_p4 = scmp.lt.s32.totalorder %s851_s18, 1  ;;  %v867_v2 = vmov 0   ;;  %v270_v3 = vld [vmem:[#allocation6] sm:$0xff]  ;;  %v271_v4 = vld [vmem:[#allocation6 + $0x8] sm:$0xff]  ;;  %v356_v30 = vlaneseq }
  0x39   : > { %268 = vst.msk [vmem:[#allocation5] sm:$0xff] %vm264_vm0, %v865_v1  ;;  %740 = vset.pattern.permute.xlu1 %v867_v2  ;;  %739 = vset.pattern.permute.xlu0 %v867_v2  ;;  %v272_v5 = vld [vmem:[#allocation6 + $0x10] sm:$0xff]  ;;  %v640_v6 = vpack.c.bf16 %v271_v4, %v270_v3  ;;  %v273_v7 = vld [vmem:[#allocation6 + $0x18] sm:$0xff]  ;;  %v274_v9 = vld [vmem:[#allocation6 + $0x20] sm:$0xff]  ;;  %v868_v29 = vmov -1e+30  }
  0x3a   : > { %s998_s29 = scalar_select %p247_p4, %s851_s18, 1  ;;  %v643_v8 = vpack.c.bf16 %v273_v7, %v272_v5  ;;  %v275_v10 = vld [vmem:[#allocation6 + $0x28] sm:$0xff]  ;;  %v276_v13 = vld [vmem:[#allocation6 + $0x30] sm:$0xff]  ;;  %v277_v14 = vld [vmem:[#allocation6 + $0x38] sm:$0xff]  ;;  %265 = vst.msk [vmem:[#allocation2] sm:$0xff] %vm264_vm0, %v868_v29  ;;  %v357_v31 = vshrl.u32 %v356_v30, 7 }
  0x3b   : > { %641 = vmatpush3.bf16.msra.mxu0 %v640_v6  ;;  %v646_v12 = vpack.c.bf16 %v275_v10, %v274_v9  ;;  %v649_v15 = vpack.c.bf16 %v277_v14, %v276_v13  ;;  %v278_v16 = vld [vmem:[#allocation6 + $0x40] sm:$0xff]  ;;  %v279_v17 = vld [vmem:[#allocation6 + $0x48] sm:$0xff]  ;;  %v280_v19 = vld [vmem:[#allocation6 + $0x50] sm:$0xff]  ;;  %s580_s12 = sshll.u32 %s851_s18, 3  ;;  %v361_v34 = vand.u32 127, %v356_v30  ;;  %vm869_vm6 = vmmov 1  }
  0x3c   : > { %s578_s30 = sshll.u32 %s998_s29, 3  ;;  %642 = vmatprep.subr.bf16.mxu0 %v864_v0  ;;  %v652_v18 = vpack.c.bf16 %v279_v17, %v278_v16  ;;  %v281_v20 = vld [vmem:[#allocation6 + $0x58] sm:$0xff]  ;;  %v282_v22 = vld [vmem:[#allocation6 + $0x60] sm:$0xff]  ;;  %v283_v23 = vld [vmem:[#allocation6 + $0x68] sm:$0xff]  ;;  %v358_v32 = vstv %s580_s12  ;;  %s244_s21 = sand.u32 1, %s843_s16  }
  0x3d   : > { %s250_s8 = scalar_lea.vmem %s1086_s0, %s578_s30  ;;  %v655_v21 = vpack.c.bf16 %v281_v20, %v280_v19  ;;  %v658_v24 = vpack.c.bf16 %v283_v23, %v282_v22  ;;  %v284_v25 = vld [vmem:[#allocation6 + $0x70] sm:$0xff]  ;;  %v285_v26 = vld [vmem:[#allocation6 + $0x78] sm:$0xff]  ;;  %s257_s11 = scalar_lea.vmem %s1088_s2, %s578_s30  ;;  %v1013_v33 = vadd.s32 %v358_v32, %v357_v31  ;;  %vm365_vm3 = vcmp.ge.s32.totalorder %v361_v34, 16 }
  0x3e   : > { %v369_v11 = vld [vmem:[%s250_s8] sm:$0xff]  ;;  %v661_v27 = vpack.c.bf16 %v285_v26, %v284_v25  ;;  %s577_s22 = sshll.u32 %s244_s21, 3  ;;  %s584_s5 = sshll.u32 %s851_s18, 7 }
  0x3f   : > { %372 = vperm.xlu1 %740, %v369_v11   ;;  %644 = vmatpush3.bf16.msra.mxu0 %v643_v8  ;;  %v269_v28 = vld [vmem:[%s257_s11] sm:$0xff]  ;;  %vm364_vm2 = vcmp.eq.s32.totalorder %v1013_v33, %v361_v34  ;;  %v403_v53 = vld [vmem:[#allocation3] sm:$0xff]  ;;  %v383_v57 = vld [vmem:[#allocation4] sm:$0xff]  ;;  %vm435_vm10 = vcmp.lt.s32.totalorder %v1013_v33, 16  ;;  %s246_s24 = scalar_lea.vmem [#allocation9], %s577_s22  ;;  %s1041_s7 = scalar_lea.hbm %s1090_s4, %s584_s5 }
  0x40   : > { %645 = vmatprep.subr.bf16.mxu0 %v864_v0  ;;  %vm1016_vm4 = vmor %vm364_vm2, %vm365_vm3  ;;  %v581_v46 = vld [vmem:[%s1087_s1] ss:$0 sm:$0xff]  ;;  %s464_s26 = sshll.u32 %s246_s24, 4  ;;  %s451_s8 = scalar_lea.sflag [#allocation8], %s244_s21  ;;  %s1036_s26 = int_to_ptr.vmem [resolvable:$true] %s464_s26 }
  0x41   : > { %v396_v39 = vld [vmem:[#allocation2] sm:$0xff]  ;;  %vm379_vm7 = vmxor %vm1016_vm4, %vm869_vm6  ;;  %v389_v60 = vld [vmem:[#allocation5] sm:$0xff]  ;;  %s777_s9 = scalar_lea.vmem %s1036_s26, 128  ;;  %p1104_p10 = scmp.ne.s32.totalorder %s1095_s25, 0 }
  0x42   : > { %p778_p8 = scmp.ne.s32.totalorder %s1036_s26, %s777_s9  ;;  %s870_s18 = smov [#allocation9]  }
  0x43   : > { %647 = vmatpush3.bf16.msra.mxu0 %v646_v12  ;;  %s781_s10 = sshll.u32 %s870_s18, 4  ;;  %s782_s10 = int_to_ptr.vmem [resolvable:$false] %s781_s10 }
  0x44   : > { %648 = vmatprep.subr.bf16.mxu0 %v864_v0  ;;  %p779_p11 = pnand %p778_p8, %p1104_p10  ;;  %s783_s11 = scalar_lea.vmem %s782_s10, 256 }
  0x45   : > { %p784_p1 = scmp.lt.s32.totalorder %s1036_s26, %s782_s10  ;;  %p785_p3 = scmp.lt.s32.totalorder %s783_s11, %s777_s9 }
  0x46   : > { %p780_p13 = pneg %p779_p11 }
  0x47   : > { %650 = vmatpush3.bf16.msra.mxu0 %v649_v15  ;;  %p786_p5 = por %p785_p3, %p784_p1 }
  0x48   : > { %651 = vmatprep.subr.bf16.mxu0 %v864_v0 }
  0x49   : > { %p787_p6 = pnand %p786_p5, %p780_p13 }
  0x4b   : > { %653 = vmatpush3.bf16.msra.mxu0 %v652_v18 }
  0x4c   : > { %654 = vmatprep.subr.bf16.mxu0 %v864_v0 }
  0x4f   : > { %656 = vmatpush3.bf16.msra.mxu0 %v655_v21 }
  0x50   : > { %657 = vmatprep.subr.bf16.mxu0 %v864_v0 }
  0x53   : > { %659 = vmatpush3.bf16.msra.mxu0 %v658_v24 }
  0x54   : > { %660 = vmatprep.subr.bf16.mxu0 %v864_v0 }
  0x57   : > { %662 = vmatpush3.bf16.msra.mxu0 %v661_v27 }
  0x5a   : > { %637 = vmatmul.mubr.f32.vlgmr.msra.gmra.mrb[0].mxu0 %v269_v28 }
  0xbe   : > { %v373_v47 = vpop.permute.xlu1 %372 }
  0xbf   : > { %vm378_vm5 = vcmp.eq.s32.totalorder %v373_v47, %v581_v46 }
  0xc0   : > { %vm380_vm8 = vmand %vm378_vm5, %vm379_vm7 }
  0xc1   : > { %v582_v49 = vsel %vm380_vm8, 1.0, %v865_v1 }
 0x12d   : > { %v352_v35 = vpop.f32.mrb[0].mxu0 }
 0x12e   : > { %v638_v37 = vpop.f32.mrb[1].mxu0  ;;  %v395_v38 = vsel %vm1016_vm4, -1e+30, %v352_v35  ;;  %v390_v50 = vmul.f32 %v582_v49, %v352_v35 }
 0x12f   : > { %397 = vmax.xlane.f32.xlu0 %v395_v38 }
 0x1bc   : > { %v398_v40 = vpop.xlane.xlu0 %397 }
 0x1bd   : > { %v399_v41 = vmax.f32 %v396_v39, %v398_v40 }
 0x1bf   : > { %v400_v42 = vsub.f32 %v396_v39, %v399_v41  ;;  %417 = vst.msk [vmem:[#allocation2] sm:$0xff] %vm264_vm0, %v399_v41  ;;  %407 = vperm.xlu0 %739, %v399_v41  }
 0x1c1   : > { %v401_v51 = vmul.f32 1.442695, %v400_v42 }
 0x1c6   : > { %v421_v4 = vld [vmem:[#allocation2] sm:$0xff] }
 0x23e   : > { %v408_v43 = vpop.permute.xlu0 %407 }
 0x23f   : > { %v410_v44 = vsub.f32 %v395_v38, %v408_v43 }
 0x241   : > { %v411_v45 = vmul.f32 1.442695, %v410_v44 }
 0x243   : > { %741 = vpow2.f32 %v411_v45 }
 0x244   : > { %743 = vpow2.f32 %v401_v51 }
 0x24d   : > { %v742_v48 = vpop.eup %741 }
 0x24e   : > { %413 = vadd.xlane.f32.xlu1 %v742_v48  ;;  %v744_v52 = vpop.eup %743 }
 0x24f   : > { %v404_v54 = vmul.f32 %v744_v52, %v403_v53 }
 0x252   : > { %384 = vadd.xlane.f32.xlu1 %v582_v49 }
 0x256   : > { %391 = vadd.xlane.f32.xlu1 %v390_v50 }
 0x2db   : > { %v414_v55 = vpop.xlane.xlu1 %413 }
 0x2dc   : > { %v415_v56 = vadd.f32 %v414_v55, %v404_v54 }
 0x2de   : > { %416 = vst.msk [vmem:[#allocation3] sm:$0xff] %vm264_vm0, %v415_v56 }
 0x2df   : > { %v385_v58 = vpop.xlane.xlu1 %384 }
 0x2e0   : > { %v386_v59 = vadd.f32 %v385_v58, %v383_v57 }
 0x2e2   : > { %388 = vst.msk [vmem:[#allocation4] sm:$0xff] %vm264_vm0, %v386_v59 }
 0x2e3   : > { %v392_v61 = vpop.xlane.xlu1 %391 }
 0x2e4   : > { %v393_v62 = vadd.f32 %v392_v61, %v389_v60 }
 0x2e5   : > { %v422_v63 = vld [vmem:[#allocation3] sm:$0xff] }
 0x2e6   : > { %394 = vst.msk [vmem:[#allocation5] sm:$0xff] %vm264_vm0, %v393_v62  ;;  %745 = vlog2.f32 %v422_v63 }
 0x2e9   : > { %v426_v0 = vld [vmem:[#allocation4] sm:$0xff] }
 0x2ea   : > { %vm427_vm9 = vcmp.gt.f32.partialorder %v426_v0, 0.0 }
 0x2eb   : > { %v428_v1 = vsel %vm427_vm9, %v426_v0, 1.0  ;;  %vm436_vm11 = vmand %vm435_vm10, %vm427_vm9 }
 0x2ec   : > { %747 = vrcp.f32 %v428_v1 }
 0x2ed   : > { %v429_v8 = vld [vmem:[#allocation5] sm:$0xff] }
 0x2f0   : > { %v746_v2 = vpop.eup %745 }
 0x2f1   : > { %v424_v3 = vmul.f32 0.6931472, %v746_v2 }
 0x2f3   : > { %v425_v5 = vadd.f32 %v424_v3, %v421_v4 }
 0x2f5   : > { %v430_v6 = vmul.f32 %v426_v0, %v425_v5 }
 0x2f6   : > { %v748_v7 = vpop.eup %747 }
 0x2f7   : > { %v431_v9 = vsub.f32 %v429_v8, %v430_v6 }
 0x2f9   : > { %v433_v10 = vmul.f32 %v748_v7, %v431_v9 }
 0x2fb   : > { %v434_v11 = vmul.f32 -1.0, %v433_v10 }
 0x2fd   : > { %v437_v12 = vsel %vm436_vm11, %v434_v11, 0.0 }
 0x2fe   : > { %v438_v13 = vsel %vm264_vm0, %v437_v12, 0.0 }
 0x2ff   : > { %439 = vadd.xlane.f32.xlu0 %v438_v13 }
 0x38c   : > { %v440_v14 = vpop.xlane.xlu0 %439 }
 0x38d   : > { %v441_v15 = vrot.slane %v440_v14, 4 }
 0x38f   : > { %v442_v16 = vadd.f32 %v441_v15, %v440_v14 }
 0x391   : > { %v443_v17 = vrot.slane %v442_v16, 2 }
 0x393   : > { %v444_v18 = vadd.f32 %v443_v17, %v442_v16 }
 0x395   : > { %v445_v19 = vrot.slane %v444_v18, 1 }
 0x397   : > { %v446_v20 = vadd.f32 %v445_v19, %v444_v18 }
 0x399   : > { %663 = vpush %v446_v20 }
 0x3ca   : > { %s664_s29 = spop %663 }
 0x3cb   : > { %v448_v21 = vstv %s664_s29 }
 0x3cc   : > { %449 = vst [vmem:[%s246_s24] sm:$0xff] %v448_v21 }
 0x3cd   : > { %790 = shalt.err (!%p787_p6)
}
 0x3ce   : > { %s791_s12 = scalar_lea.hbm %s1041_s7, 128  ;;  %s795_s21 = scalar_lea.hbm %s1090_s4, 256 }
 0x3cf   : > { %p792_p7 = scmp.ne.s32.totalorder %s1041_s7, %s791_s12  ;;  %p796_p0 = scmp.lt.u32.totalorder %s1041_s7, %s1090_s4 }
 0x3d0   : > { %p797_p2 = scmp.lt.u32.totalorder %s795_s21, %s791_s12  ;;  %p799_p8 = scmp.lt.u32.totalorder %s791_s12, %s1041_s7 }
 0x3d1   : > { %p793_p9 = pnand %p792_p7, %p1104_p10 }
 0x3d2   : > { %p798_p4 = por %p797_p2, %p796_p0 }
 0x3d3   : > { %p794_p12 = pneg %p793_p9 }
 0x3d4   : > { %p800_p11 = por %p799_p8, %p798_p4 }
 0x3d6   : > { %p801_p13 = pnand %p800_p11, %p794_p12 }
 0x3d8   : > { %804 = shalt.err (!%p801_p13)
}
 0x3d9   : > { %669 = dma.vmem_to_hbm [thread:$0]  (%p1104_p10), %s1036_s26, 128, %s1041_s7, %s451_s8  }
 0x3da PF: > { %p681_p1 = scmp.ge.s32.totalorder %s859_s20, 2  ;;  %s476_s5 = sand.u32 1, %s839_s15  }
 0x3db   : > { %p1105_p3 = scmp.ne.s32.totalorder %s1096_s27, 0  ;;  %s477_s29 = scalar_lea.sflag [#allocation8], %s476_s5 }
 0x3dd   : > { %p676_p5 = pnand %p681_p1, %p1105_p3 }
 0x3df   : > { %834 = dma.done.wait (!%p676_p5), %s477_s29, 128  }
 0x3e0   : > { %836 = vsyncadd (!%p676_p5), %s477_s29, 4294967168  ;;  %s18_s20 = sadd.s32 1, %s859_s20   ;;  %s1106_s15 = smov %s843_s16 }
 0x3e1   : > { %p15_p6 = scmp.ge.s32.totalorder %s18_s20, 4   ;;  %s1107_s16 = smov %s847_s17 }
 0x3e2   : > { %s1108_s17 = smov %s949_s28  ;;  %s1109_s18 = smov %s855_s19 }
 0x3e3   : > { %s1110_s19 = smov %s1112_s23  ;;  %17 = sbr.rel (!%p15_p6) target bundleno = 5 (0x5), region = 91 }
 0x3ea   :  { %482 = vsyncpa [#allocation7], 1 }
 0x3eb   :  { %484 = vsyncpa [#allocation7 + $0x1], 1 }
 0x3ec   :  { %485 = vsyncpa [#allocation8], 1 }
 0x3ed   :  { %487 = vsyncpa [#allocation8 + $0x1], 1 }

</bundles_post_ra>
